<compile_context>
chip_gen: v5e
topology: v5e:2x2
jax: 0.10.0
libtpu: 0.0.40
codegen_flags: <defaults>
</compile_context>

<pallas_src>
import jax
import jax.numpy as jnp
from jax.experimental import pallas as pl
from jax.experimental.pallas import tpu as pltpu


# ----------------------------------------------------------------------------
# Single-matrix kernel (matches the nn.Module forward exactly) — scalar path.
# ----------------------------------------------------------------------------
def _recall_kernel(cm_ref, o_ref):
    # cm_ref: (4,) float32 SMEM ref holding [tn, fp, fn, tp] (raveled confusion matrix).
    # o_ref : (1,) float32 SMEM ref.
    fn = cm_ref[2]
    tp = cm_ref[3]

    denom = fn + tp
    valid = denom > jnp.float32(0.0)
    safe_denom = jnp.where(valid, denom, jnp.float32(1.0))  # avoid 0/0 NaN
    o_ref[0] = jnp.where(valid, tp / safe_denom, jnp.float32(0.0))


def bi_cls_recall(confusion_matrix):
    """confusion_matrix: array-like of shape (2, 2) (or anything that ravels to 4 entries).

    Returns a (1,) float32 array holding recall = tp / (fn + tp), or 0.0 if fn + tp == 0.
    """
    cm = jnp.ravel(jnp.asarray(confusion_matrix)).astype(jnp.float32)  # (4,) = [tn, fp, fn, tp]
    return pl.pallas_call(
        _recall_kernel,
        out_shape=jax.ShapeDtypeStruct((1,), jnp.float32),
        in_specs=[pl.BlockSpec(memory_space=pltpu.SMEM)],
        out_specs=pl.BlockSpec(memory_space=pltpu.SMEM),
    )(cm)


# ----------------------------------------------------------------------------
# Batched kernel: N confusion matrices -> N recalls in one launch (VPU, lane-dense).
# ----------------------------------------------------------------------------
def _recall_batched_kernel(cm_ref, o_ref):
    # cm_ref: (4, tile_n) float32 VMEM tile; rows = [tn, fp, fn, tp], batch on the lane axis.
    # o_ref : (1, tile_n) float32 VMEM tile (lane-dense output -> unmasked vst).
    fn = cm_ref[2:3, :]
    tp = cm_ref[3:4, :]

    denom = fn + tp
    valid = denom > jnp.float32(0.0)
    safe_denom = jnp.where(valid, denom, jnp.float32(1.0))
    o_ref[...] = jnp.where(valid, tp / safe_denom, jnp.float32(0.0))


def bi_cls_recall_batched(confusion_matrices, *, tile_n=512):
    """confusion_matrices: array-like of shape (N, 2, 2).

    Returns a (N,) float32 array of recalls (0.0 where fn + tp == 0).
    """
    cms = jnp.asarray(confusion_matrices).astype(jnp.float32)
    n = cms.shape[0]
    tile_n = min(tile_n, pl.cdiv(n, 128) * 128)      # keep tiles lane-aligned but not oversized
    n_pad = pl.cdiv(n, tile_n) * tile_n

    # (N, 2, 2) -> (N, 4) -> (4, N): batch on the fast (lane) axis, one row per cm entry.
    flat = cms.reshape(n, 4).T
    if n_pad != n:
        flat = jnp.pad(flat, ((0, 0), (0, n_pad - n)))  # padded cols: fn+tp==0 -> recall 0

    out = pl.pallas_call(
        _recall_batched_kernel,
        out_shape=jax.ShapeDtypeStruct((1, n_pad), jnp.float32),
        grid_spec=pltpu.PrefetchScalarGridSpec(
            num_scalar_prefetch=0,
            grid=(n_pad // tile_n,),
            in_specs=[pl.BlockSpec((4, tile_n), lambda i: (0, i))],
            out_specs=pl.BlockSpec((1, tile_n), lambda i: (0, i)),
        ),
        compiler_params=pltpu.CompilerParams(
            dimension_semantics=("parallel",)  # shards the batch across v7x's 2 TCs; no-op on v5e/v6e
        ),
    )(flat)
    return out[0, :n]


if __name__ == "__main__":
    key = jax.random.PRNGKey(0)

    # ---- Single-matrix path (module semantics) ----
    cm = jax.random.randint(key, (2, 2), minval=0, maxval=50, dtype=jnp.int32) + 1
    out = jax.block_until_ready(bi_cls_recall(cm))

    tn, fp, fn, tp = [float(v) for v in jnp.ravel(cm).astype(jnp.float32)]
    ref = tp / (fn + tp) if (fn + tp) > 0 else 0.0
    assert out.shape == (1,) and out.dtype == jnp.float32, (out.shape, out.dtype)
    assert abs(float(out[0]) - ref) < 1e-6, (float(out[0]), ref)

    # Fallback path: no positive labels -> recall must be exactly 0.0, no NaN.
    cm_zero = jnp.array([[5, 3], [0, 0]], dtype=jnp.int32)
    out_zero = jax.block_until_ready(bi_cls_recall(cm_zero))
    assert float(out_zero[0]) == 0.0, float(out_zero[0])

    # ---- Batched path (the performance-relevant variant) ----
    kb = jax.random.PRNGKey(1)
    N = 300  # deliberately not a multiple of 128 to exercise padding
    cms = jax.random.randint(kb, (N, 2, 2), minval=0, maxval=50, dtype=jnp.int32)
    # Force a few zero-positive rows to exercise the guard.
    cms = cms.at[0, 1, :].set(0)
    cms = cms.at[7, 1, :].set(0)

    out_b = jax.block_until_ready(bi_cls_recall_batched(cms))

    cms_f = cms.astype(jnp.float32)
    fn_b = cms_f[:, 1, 0]
    tp_b = cms_f[:, 1, 1]
    denom_b = fn_b + tp_b
    ref_b = jnp.where(denom_b > 0, tp_b / jnp.where(denom_b > 0, denom_b, 1.0), 0.0)

    assert out_b.shape == (N,) and out_b.dtype == jnp.float32, (out_b.shape, out_b.dtype)
    assert bool(jnp.all(jnp.abs(out_b - ref_b) < 1e-6)), "batched recall mismatch"
    assert float(out_b[0]) == 0.0 and float(out_b[7]) == 0.0

    print("KERNEL_OK")
</pallas_src>

<mosaic_0001>
module attributes {stable_mosaic.version = 11 : i64} {
  func.func @_recall_kernel(%arg0: memref<4xf32, #tpu.memory_space<smem>>, %arg1: memref<1xf32, #tpu.memory_space<smem>>) attributes {dimension_semantics = [], scalar_prefetch = 0 : i64, scratch_operands = 0 : i64, tpu.core_type = #tpu.core_type<tc>} {
    %c2 = arith.constant 2 : index
    %0 = memref.load %arg0[%c2] : memref<4xf32, #tpu.memory_space<smem>>
    %c3 = arith.constant 3 : index
    %1 = memref.load %arg0[%c3] : memref<4xf32, #tpu.memory_space<smem>>
    %2 = arith.addf %0, %1 : f32
    %cst = arith.constant 0.000000e+00 : f32
    %3 = arith.cmpf ogt, %2, %cst : f32
    %cst_0 = arith.constant 1.000000e+00 : f32
    %4 = arith.select %3, %2, %cst_0 : f32
    %5 = arith.divf %1, %4 : f32
    %cst_1 = arith.constant 0.000000e+00 : f32
    %6 = arith.select %3, %5, %cst_1 : f32
    %c0 = arith.constant 0 : index
    %7 = memref.load %arg1[%c0] : memref<1xf32, #tpu.memory_space<smem>>
    memref.store %6, %arg1[%c0] : memref<1xf32, #tpu.memory_space<smem>>
    return
  }
}

</mosaic_0001>

<bundles_post_ra>
// kernel: tpu_custom_call.1
= control target key start
LH: loop header
LB: loop body
LE: loop exit
PB: predicated region body
PF: predicated region fallthrough
CT: control target
= control target key end

     0   :  { %6 = vsyncpa [#allocation3], 0  ;;  %s119_s0 = inlined_call_operand.hbm [shape: f32[4], index: 0, kind: input, shape index: {}]   ;;  %s120_s1 = inlined_call_operand.hbm [shape: f32[1], index: 1, kind: output, shape index: {}]  }
   0x1   :  { %7 = vsyncpa [#allocation4], 0  ;;  %s13_s8 = sshll.u32 %s119_s0, 4  ;;  %s99_s9 = smov [#allocation2]   ;;  %s14_s8 = int_to_ptr.hbm [resolvable:$true] %s13_s8 }
   0x2   :  { %16 = dma.hbm_to_smem %s14_s8, 16, %s99_s9, [#allocation3]  }
   0x3   :  { %95 = dma.done.wait [#allocation3], 16  }
   0x4   :  { %96 = vsyncadd [#allocation3], 4294967280 }
   0x5   :  { %21 = sfence }
   0x6   :  { %s63_s10 = sld [smem:[#allocation2 + $0x2]]  ;;  %s52_s15 = sshll.u32 %s120_s1, 4  ;;  %s53_s15 = int_to_ptr.hbm [resolvable:$true] %s52_s15 }
   0x7   :  { %s64_s11 = sld [smem:[#allocation2 + $0x3]]  ;;  %s100_s18 = smov [#allocation5]  }
   0xd   :  { %s24_s12 = sadd.f32 %s64_s11, %s63_s10 }
   0xf   :  { %p25_p0 = scmp.gt.f32.partialorder %s24_s12, 0.0 }
  0x11   :  { %s26_s13 = scalar_select %p25_p0, %s24_s12, 1.0 }
  0x13   :  { %v27_v0 = vstv %s26_s13 }
  0x14   :  { %69 = vrcp.f32 %v27_v0  ;;  %v39_v3 = vand.u32 2147483648, %v27_v0  ;;  %vm33_vm0 = vweird.f32 %v27_v0  ;;  %v37_v5 = vand.u32 2147483647, %v27_v0 }
  0x16   :  { %v40_v7 = vor.u32 1.1754944e-38, %v39_v3  ;;  %vm38_vm3 = vcmp.eq.f32.partialorder %v37_v5, 8.507059e+37 }
  0x1a   :  { %v70_v1 = vpop.eup %69 }
  0x1b   :  { %v29_v2 = vmul.f32 %v70_v1, %v27_v0  ;;  %vm34_vm1 = vweird.f32 %v70_v1 }
  0x1c   :  { %vm35_vm2 = vmor %vm33_vm0, %vm34_vm1 }
  0x1d   :  { %v30_v4 = vsub.f32 1.0, %v29_v2 }
  0x1f   :  { %v31_v6 = vmul.f32 %v70_v1, %v30_v4 }
  0x21   :  { %v32_v8 = vadd.f32 %v70_v1, %v31_v6 }
  0x23   :  { %v36_v9 = vsel %vm35_vm2, %v70_v1, %v32_v8 }
  0x24   :  { %v41_v10 = vsel %vm38_vm3, %v40_v7, %v36_v9 }
  0x25   :  { %65 = vpush %v41_v10 }
  0x56   :  { %s66_s16 = spop %65 }
  0x57   :  { %s43_s17 = smul.f32 %s66_s16, %s64_s11 }
  0x59   :  { %s122_s17 = smov (!%p25_p0, %s43_s17), 0.0 }
  0x5a   :  { %46 = sst [smem:[#allocation5]] %s122_s17 }
  0x5b   :  { %55 = dma.smem_to_hbm %s100_s18, 16, %s53_s15, [#allocation4]  }
  0x5c   :  { %97 = dma.done.wait [#allocation4], 16  }
  0x5d   :  { %98 = vsyncadd [#allocation4], 4294967280 }
  0x5e   :  { %60 = sfence }
  0x5f   :  { %61 = vsyncpa [#allocation3], 1 }
  0x60   :  { %62 = vsyncpa [#allocation4], 1 }

</bundles_post_ra>
